<compile_context>
chip_gen: v7x
topology: tpu7x:2x2x1
jax: 0.10.0
libtpu: 0.0.40
codegen_flags: <defaults>
</compile_context>

<pallas_src>
import functools

import jax
import jax.numpy as jnp
import numpy as np
from jax.experimental import pallas as pl
from jax.experimental.pallas import tpu as pltpu

_LANE = 128
_SUBLANE = 8


def _round_up(x, m):
    return ((x + m - 1) // m) * m


def _vmem_capacity_bytes():
    try:
        return int(pltpu.get_tpu_info().vmem_capacity_bytes)
    except Exception:
        return 64 * 1024 * 1024  # v7x per-core VMEM (smallest current gen)


def _plan_tiles(n, d, c_pad, in_bytes, requested):
    """Pick the row tile and estimate VMEM usage (bytes)."""
    vmem_cap = _vmem_capacity_bytes()
    budget = int(vmem_cap * 0.6)  # headroom for compiler scratch / vreg spills
    # Resident blocks (double-buffered by the pipeline): centers, cen_sq, out.
    fixed = 2 * c_pad * d * in_bytes + 2 * c_pad * 4 + 2 * _LANE * 4
    # Per image row: double-buffered row + ids + ~3 f32 (row, C)-wide
    # intermediates (sim / mask / select) that spill to VMEM for large tiles.
    per_row = 2 * d * in_bytes + 2 * 4 + 3 * c_pad * 4
    if requested is None:
        tile_n = (budget - fixed) // max(per_row, 1)
        tile_n = max(_SUBLANE, min(1024, (tile_n // _SUBLANE) * _SUBLANE))
    else:
        tile_n = max(_SUBLANE, (int(requested) // _SUBLANE) * _SUBLANE)
    tile_n = min(tile_n, _round_up(n, _SUBLANE))
    est_bytes = fixed + per_row * tile_n
    return tile_n, est_bytes, vmem_cap


def _vitri_loss_kernel(ids_ref, img_ref, cen_ref, cen_sq_ref, out_ref, *,
                       margin, n_valid, tile_n):
    img = img_ref[...]                    # (TILE_N, D)  f32 or bf16
    ids = ids_ref[...]                    # (TILE_N, 1)  i32
    tn = img.shape[0]
    c = cen_ref.shape[0]

    # sim[i, j] = <img_i, center_j>; contract last dims directly (no explicit
    # (D, C) transpose of the centers feeding the MXU).
    sim = jax.lax.dot_general(
        img, cen_ref[...], (((1,), (1,)), ((), ())),
        preferred_element_type=jnp.float32)                     # (TILE_N, C) f32

    col = jax.lax.broadcasted_iota(jnp.int32, (tn, c), 1)
    pos_mask = col == ids                                       # one-hot of object_ids

    # Positive dot product and anchor squared norm via masked VPU lane-reduces
    # (no gather, no degenerate one-hot matmul).
    pos_dot = jnp.sum(jnp.where(pos_mask, sim, 0.0), axis=1, keepdims=True)
    anchor_sq = jnp.sum(jnp.where(pos_mask, cen_sq_ref[...], 0.0),
                        axis=1, keepdims=True)                  # (TILE_N, 1)

    img_f32 = img.astype(jnp.float32)
    img_sq = jnp.sum(img_f32 * img_f32, axis=1, keepdims=True)  # (TILE_N, 1)

    # cosine = dot * rsqrt(max(|a|^2 |b|^2, eps^2))   (single EUP rsqrt)
    eps = jnp.float32(1e-8)
    cos_pos = pos_dot * jax.lax.rsqrt(jnp.maximum(img_sq * anchor_sq, eps * eps))

    # losses = relu((1 - positive_similarity) + margin)
    losses = jnp.maximum((1.0 - cos_pos) + jnp.float32(margin), 0.0)

    # Mask rows beyond N (the last grid block may read past the array end).
    row = pl.program_id(0) * tile_n + jax.lax.broadcasted_iota(
        jnp.int32, (tn, 1), 0)
    losses = jnp.where(row < n_valid, losses, 0.0)

    tile_sum = jnp.sum(losses)
    tile_cnt = jnp.sum((losses > 0.0).astype(jnp.float32))

    # Per-tile partials: lane 0 = sum(losses), lane 1 = count_nonzero.
    lane = jax.lax.broadcasted_iota(jnp.int32, (1, 1, _LANE), 2)
    out_ref[...] = jnp.where(lane == 0, tile_sum,
                             jnp.where(lane == 1, tile_cnt, 0.0))

    # Note: the hardest-negative branch of the PyTorch module (masked max,
    # negative gather, negative cosine) never contributes to the returned loss
    # and is intentionally omitted.


def vitri_loss(image_features, object_ids, center_features, margin=0.5,
               tile_n=None, use_bf16=False):
    image_features = jnp.asarray(image_features, jnp.float32)
    center_features = jnp.asarray(center_features, jnp.float32)
    object_ids = jnp.asarray(object_ids, jnp.int32)

    n, d = image_features.shape
    c, _ = center_features.shape

    # Pad the (small) centers array so the sim tile is lane-dense.  Zero-padded
    # centers can never be matched by object_ids in [0, C).
    c_pad = _round_up(max(c, _SUBLANE), _LANE)
    centers_f32 = center_features
    if c_pad != c:
        centers_f32 = jnp.pad(centers_f32, ((0, c_pad - c), (0, 0)))

    # Per-center squared norms, always in f32 (one tiny XLA reduce, reused by
    # every row tile inside the kernel).
    cen_sq = jnp.sum(centers_f32 * centers_f32, axis=1,
                     dtype=jnp.float32).reshape(1, c_pad)

    if use_bf16:
        img_in = image_features.astype(jnp.bfloat16)
        cen_in = centers_f32.astype(jnp.bfloat16)
        in_bytes = 2
    else:
        img_in = image_features
        cen_in = centers_f32
        in_bytes = 4

    tile_n, est_bytes, vmem_cap = _plan_tiles(n, d, c_pad, in_bytes, tile_n)
    num_tiles = -(-n // tile_n)

    ids2d = object_ids.reshape(n, 1)

    kernel = functools.partial(_vitri_loss_kernel, margin=float(margin),
                               n_valid=n, tile_n=tile_n)

    grid_spec = pltpu.PrefetchScalarGridSpec(
        num_scalar_prefetch=0,
        grid=(num_tiles,),
        in_specs=[
            pl.BlockSpec((tile_n, 1), lambda i: (i, 0)),    # object ids per tile
            pl.BlockSpec((tile_n, d), lambda i: (i, 0)),    # image feature rows
            pl.BlockSpec((c_pad, d), lambda i: (0, 0)),     # centers (resident)
            pl.BlockSpec((1, c_pad), lambda i: (0, 0)),     # per-center |c|^2 row
        ],
        out_specs=pl.BlockSpec((1, 1, _LANE), lambda i: (i, 0, 0)),
    )

    cp_kwargs = dict(dimension_semantics=("parallel",))
    if est_bytes > 16 * 1024 * 1024:  # exceeds the smallest scoped default (v5e)
        cp_kwargs["vmem_limit_bytes"] = int(
            min(vmem_cap * 0.85, max(est_bytes * 2, 32 * 1024 * 1024)))

    partials = pl.pallas_call(
        kernel,
        out_shape=jax.ShapeDtypeStruct((num_tiles, 1, _LANE), jnp.float32),
        grid_spec=grid_spec,
        compiler_params=pltpu.CompilerParams(**cp_kwargs),
    )(ids2d, img_in, cen_in, cen_sq)

    total = jnp.sum(partials[:, 0, 0])
    count = jnp.sum(partials[:, 0, 1])
    return jnp.where(count > 0.0, total / count, total)


def _reference(image_features, object_ids, center_features, margin=0.5):
    # Pure-JAX mirror of the PyTorch module's *returned* value.
    anchor = center_features[object_ids]
    eps = 1e-8
    w12 = jnp.sum(image_features * anchor, axis=1)
    w1 = jnp.sum(image_features * image_features, axis=1)
    w2 = jnp.sum(anchor * anchor, axis=1)
    pos = w12 / jnp.sqrt(jnp.maximum(w1 * w2, eps * eps))
    losses = jax.nn.relu((1.0 - pos) + margin)
    total = jnp.sum(losses)
    count = jnp.sum(losses != 0.0)
    return jnp.where(count > 0, total / count, total)


if __name__ == "__main__":
    N, C, D = 16, 16, 32
    key = jax.random.PRNGKey(0)
    k1, k2, k3 = jax.random.split(key, 3)
    image_features = jax.random.normal(k1, (N, D), dtype=jnp.float32)
    center_features = jax.random.normal(k2, (C, D), dtype=jnp.float32)
    object_ids = jax.random.randint(k3, (N,), 0, C, dtype=jnp.int32)

    # Multi-tile path (grid of 2, per-tile partials + wrapper reduce exercised).
    loss = vitri_loss(image_features, object_ids, center_features,
                      margin=0.5, tile_n=8)
    jax.block_until_ready(loss)
    ref = _reference(image_features, object_ids, center_features, margin=0.5)
    np.testing.assert_allclose(np.asarray(loss), np.asarray(ref),
                               rtol=1e-5, atol=1e-5)

    # Ragged-N path with auto tile sizing (partial last block masked in-kernel).
    loss2 = vitri_loss(image_features[:13], object_ids[:13], center_features,
                       margin=0.5)
    jax.block_until_ready(loss2)
    ref2 = _reference(image_features[:13], object_ids[:13], center_features,
                      margin=0.5)
    np.testing.assert_allclose(np.asarray(loss2), np.asarray(ref2),
                               rtol=1e-5, atol=1e-5)

    print("KERNEL_OK")
</pallas_src>

<mosaic_0001>
module attributes {stable_mosaic.version = 11 : i64} {
  func.func @_vitri_loss_kernel(%arg0: i32, %arg1: memref<8x1xi32, #tpu.memory_space<vmem>>, %arg2: memref<8x32xf32, #tpu.memory_space<vmem>>, %arg3: memref<128x32xf32, #tpu.memory_space<vmem>>, %arg4: memref<1x128xf32, #tpu.memory_space<vmem>>, %arg5: memref<1x1x128xf32, #tpu.memory_space<vmem>>) attributes {dimension_semantics = [#tpu.dimension_semantics<parallel>], iteration_bounds = array<i64: 2>, scalar_prefetch = 0 : i64, scratch_operands = 0 : i64, tpu.core_type = #tpu.core_type<tc>, window_params = [{transform_indices = @transform_0, window_bounds = array<i64: 8, 1>}, {transform_indices = @transform_1, window_bounds = array<i64: 8, 32>}, {pipeline_mode = #tpu.pipeline_mode<synchronous>, transform_indices = @transform_2, window_bounds = array<i64: 128, 32>}, {pipeline_mode = #tpu.pipeline_mode<synchronous>, transform_indices = @transform_3, window_bounds = array<i64: 1, 128>}, {transform_indices = @transform_4, window_bounds = array<i64: 1, 1, 128>}]} {
    %c0 = arith.constant 0 : index
    %c0_0 = arith.constant 0 : index
    %0 = vector.load %arg2[%c0, %c0_0] : memref<8x32xf32, #tpu.memory_space<vmem>>, vector<8x32xf32>
    %c0_1 = arith.constant 0 : index
    %c0_2 = arith.constant 0 : index
    %1 = vector.load %arg1[%c0_1, %c0_2] : memref<8x1xi32, #tpu.memory_space<vmem>>, vector<8x1xi32>
    %c0_3 = arith.constant 0 : index
    %c0_4 = arith.constant 0 : index
    %2 = vector.load %arg3[%c0_3, %c0_4] : memref<128x32xf32, #tpu.memory_space<vmem>>, vector<128x32xf32>
    %cst = arith.constant dense<0.000000e+00> : vector<8x128xf32>
    %3 = tpu.matmul %0, %2, %cst {dimension_numbers = #tpu.dot_dimension_numbers<[1], [1], [0], [0], [0, 0, 1, 0], [], []>} : vector<8x32xf32>, vector<128x32xf32>, vector<8x128xf32> -> vector<8x128xf32>
    %4 = tpu.iota {dimensions = array<i32: 1>} : vector<8x128xi32>
    %5 = vector.broadcast %1 : vector<8x1xi32> to vector<8x128xi32>
    %6 = arith.cmpi eq, %4, %5 : vector<8x128xi32>
    %cst_5 = arith.constant 0.000000e+00 : f32
    %7 = vector.broadcast %cst_5 : f32 to vector<8x128xf32>
    %8 = arith.select %6, %3, %7 : vector<8x128xi1>, vector<8x128xf32>
    %cst_6 = arith.constant dense<0.000000e+00> : vector<8xf32>
    %9 = vector.multi_reduction <add>, %8, %cst_6 [1] : vector<8x128xf32> to vector<8xf32>
    %10 = vector.shape_cast %9 : vector<8xf32> to vector<8x1xf32>
    %c0_7 = arith.constant 0 : index
    %c0_8 = arith.constant 0 : index
    %11 = vector.load %arg4[%c0_7, %c0_8] : memref<1x128xf32, #tpu.memory_space<vmem>>, vector<1x128xf32>
    %cst_9 = arith.constant 0.000000e+00 : f32
    %12 = vector.shape_cast %11 : vector<1x128xf32> to vector<1x128xf32>
    %13 = vector.broadcast %12 : vector<1x128xf32> to vector<8x128xf32>
    %14 = vector.broadcast %cst_9 : f32 to vector<8x128xf32>
    %15 = arith.select %6, %13, %14 : vector<8x128xi1>, vector<8x128xf32>
    %cst_10 = arith.constant dense<0.000000e+00> : vector<8xf32>
    %16 = vector.multi_reduction <add>, %15, %cst_10 [1] : vector<8x128xf32> to vector<8xf32>
    %17 = vector.shape_cast %16 : vector<8xf32> to vector<8x1xf32>
    %18 = arith.mulf %0, %0 : vector<8x32xf32>
    %cst_11 = arith.constant dense<0.000000e+00> : vector<8xf32>
    %19 = vector.multi_reduction <add>, %18, %cst_11 [1] : vector<8x32xf32> to vector<8xf32>
    %20 = vector.shape_cast %19 : vector<8xf32> to vector<8x1xf32>
    %21 = arith.mulf %20, %17 : vector<8x1xf32>
    %cst_12 = arith.constant 9.99999993E-9 : f32
    %cst_13 = arith.constant 9.99999993E-9 : f32
    %22 = arith.mulf %cst_12, %cst_13 : f32
    %23 = vector.broadcast %22 : f32 to vector<8x1xf32>
    %24 = arith.maximumf %21, %23 : vector<8x1xf32>
    %25 = math.rsqrt %24 : vector<8x1xf32>
    %26 = arith.mulf %10, %25 : vector<8x1xf32>
    %cst_14 = arith.constant 1.000000e+00 : f32
    %27 = vector.broadcast %cst_14 : f32 to vector<8x1xf32>
    %28 = arith.subf %27, %26 : vector<8x1xf32>
    %cst_15 = arith.constant 5.000000e-01 : f32
    %29 = vector.broadcast %cst_15 : f32 to vector<8x1xf32>
    %30 = arith.addf %28, %29 : vector<8x1xf32>
    %cst_16 = arith.constant 0.000000e+00 : f32
    %31 = vector.broadcast %cst_16 : f32 to vector<8x1xf32>
    %32 = arith.maximumf %30, %31 : vector<8x1xf32>
    %c8_i32 = arith.constant 8 : i32
    %33 = arith.muli %arg0, %c8_i32 : i32
    %34 = tpu.iota {dimensions = array<i32: 0>} : vector<8x1xi32>
    %35 = vector.broadcast %33 : i32 to vector<8x1xi32>
    %36 = arith.addi %35, %34 : vector<8x1xi32>
    %c16_i32 = arith.constant 16 : i32
    %37 = vector.broadcast %c16_i32 : i32 to vector<8x1xi32>
    %38 = arith.cmpi slt, %36, %37 : vector<8x1xi32>
    %cst_17 = arith.constant 0.000000e+00 : f32
    %39 = vector.broadcast %cst_17 : f32 to vector<8x1xf32>
    %40 = arith.select %38, %32, %39 : vector<8x1xi1>, vector<8x1xf32>
    %41 = vector.shape_cast %40 : vector<8x1xf32> to vector<1x8x1xf32>
    %cst_18 = arith.constant dense<0.000000e+00> : vector<1xf32>
    %42 = vector.multi_reduction <add>, %41, %cst_18 [1, 2] : vector<1x8x1xf32> to vector<1xf32>
    %43 = vector.shape_cast %42 : vector<1xf32> to vector<1x1x1xf32>
    %44 = vector.extract %43[0, 0, 0] : f32 from vector<1x1x1xf32>
    %cst_19 = arith.constant 0.000000e+00 : f32
    %45 = vector.broadcast %cst_19 : f32 to vector<8x1xf32>
    %46 = arith.cmpf ogt, %40, %45 : vector<8x1xf32>
    %47 = arith.extui %46 : vector<8x1xi1> to vector<8x1xi32>
    %48 = arith.sitofp %47 : vector<8x1xi32> to vector<8x1xf32>
    %49 = vector.shape_cast %48 : vector<8x1xf32> to vector<1x8x1xf32>
    %cst_20 = arith.constant dense<0.000000e+00> : vector<1xf32>
    %50 = vector.multi_reduction <add>, %49, %cst_20 [1, 2] : vector<1x8x1xf32> to vector<1xf32>
    %51 = vector.shape_cast %50 : vector<1xf32> to vector<1x1x1xf32>
    %52 = vector.extract %51[0, 0, 0] : f32 from vector<1x1x1xf32>
    %53 = tpu.iota {dimensions = array<i32: 2>} : vector<1x1x128xi32>
    %c0_i32 = arith.constant 0 : i32
    %54 = vector.broadcast %c0_i32 : i32 to vector<1x1x128xi32>
    %55 = arith.cmpi eq, %53, %54 : vector<1x1x128xi32>
    %c1_i32 = arith.constant 1 : i32
    %56 = vector.broadcast %c1_i32 : i32 to vector<1x1x128xi32>
    %57 = arith.cmpi eq, %53, %56 : vector<1x1x128xi32>
    %cst_21 = arith.constant 0.000000e+00 : f32
    %58 = vector.broadcast %52 : f32 to vector<1x1x128xf32>
    %59 = vector.broadcast %cst_21 : f32 to vector<1x1x128xf32>
    %60 = arith.select %57, %58, %59 : vector<1x1x128xi1>, vector<1x1x128xf32>
    %61 = vector.broadcast %44 : f32 to vector<1x1x128xf32>
    %62 = arith.select %55, %61, %60 : vector<1x1x128xi1>, vector<1x1x128xf32>
    %c0_22 = arith.constant 0 : index
    %c0_23 = arith.constant 0 : index
    %c0_24 = arith.constant 0 : index
    %63 = vector.load %arg5[%c0_22, %c0_23, %c0_24] : memref<1x1x128xf32, #tpu.memory_space<vmem>>, vector<1x1x128xf32>
    tpu.vector_store %arg5[%c0_22, %c0_23, %c0_24], %62 {strides = array<i32>} : memref<1x1x128xf32, #tpu.memory_space<vmem>>, vector<1x1x128xf32>,
    return
  }
  func.func @transform_0(%arg0: i32) -> (i32, i32) {
    %c0_i32 = arith.constant 0 : i32
    %c0_i32_0 = arith.constant 0 : i32
    return %arg0, %c0_i32 : i32, i32
  }
  func.func @transform_1(%arg0: i32) -> (i32, i32) {
    %c0_i32 = arith.constant 0 : i32
    %c0_i32_0 = arith.constant 0 : i32
    return %arg0, %c0_i32 : i32, i32
  }
  func.func @transform_2(%arg0: i32) -> (i32, i32) {
    %c0_i32 = arith.constant 0 : i32
    %c0_i32_0 = arith.constant 0 : i32
    %c0_i32_1 = arith.constant 0 : i32
    return %c0_i32, %c0_i32_0 : i32, i32
  }
  func.func @transform_3(%arg0: i32) -> (i32, i32) {
    %c0_i32 = arith.constant 0 : i32
    %c0_i32_0 = arith.constant 0 : i32
    %c0_i32_1 = arith.constant 0 : i32
    return %c0_i32, %c0_i32_0 : i32, i32
  }
  func.func @transform_4(%arg0: i32) -> (i32, i32, i32) {
    %c0_i32 = arith.constant 0 : i32
    %c0_i32_0 = arith.constant 0 : i32
    %c0_i32_1 = arith.constant 0 : i32
    return %arg0, %c0_i32, %c0_i32_0 : i32, i32, i32
  }
}

</mosaic_0001>

<bundles_post_ra>
// kernel: tpu_custom_call.1
= control target key start
LH: loop header
LB: loop body
LE: loop exit
PB: predicated region body
PF: predicated region fallthrough
CT: control target
= control target key end

     0   :  { %9 = vsyncpa [#allocation3], 0  ;;  %s940_s0 = inlined_call_operand.vmem [shape: s32[16,1], index: 0, kind: input, shape index: {}]   ;;  %s941_s1 = inlined_call_operand.vmem [shape: f32[16,32], index: 1, kind: input, shape index: {}]   ;;  %s942_s2 = inlined_call_operand.vmem [shape: f32[128,32], index: 2, kind: input, shape index: {}]   ;;  %s943_s3 = inlined_call_operand.vmem [shape: f32[1,128], index: 3, kind: input, shape index: {}]   ;;  %s944_s4 = inlined_call_operand.hbm [shape: f32[2,1,128], index: 4, kind: output, shape index: {}]  }
   0x1   :  { %11 = vsyncpa [#allocation3 + $0x1], 0  ;;  %s754_s15 = smov 0   ;;  %s756_s16 = smov 0  }
   0x2   :  { %s758_s17 = smov 0   ;;  %s760_s18 = smov 0  }
   0x3 LB: > { %s775_s19 = sadd.s32 4294967295, %s722_s18   ;;  %s497_s20 = sadd.s32 4294967294, %s722_s18   ;;  %s722_s18 = sphi %s760_s18, %s952_s18   ;;  %s718_s17 = sphi %s758_s17, %s951_s17   ;;  %s714_s16 = sphi %s756_s16, %s950_s16   ;;  %s710_s15 = sphi %s754_s15, %s949_s15  }
   0x4   : > { %s779_s21 = sadd.s32 1, %s722_s18   ;;  %s118_s22 = sadd.s32 1, %s718_s17 }
   0x5   : > { %s115_s23 = ssub.s32 %s722_s18, %s779_s21  ;;  %p128_p0 = scmp.ne.s32.totalorder %s718_s17, %s714_s16 }
   0x6   : > { %p116_p1 = scmp.eq.s32.totalorder %s115_s23, 0  ;;  %p129_p2 = scmp.eq.s32.totalorder %s775_s19, 1 }
   0x7   : > { %p134_p3 = scmp.ne.s32.totalorder %s714_s16, %s710_s15  ;;  %p135_p4 = scmp.eq.s32.totalorder %s497_s20, 1 }
   0x8   : > { %s790_s24 = scalar_select %p116_p1, %s718_s17, %s118_s22  }
   0x9   : > { %p792_p5 = por %p129_p2, %p128_p0  ;;  %p796_p6 = por %p135_p4, %p134_p3 }
   0xa   : > { %p500_p7 = scmp.ge.s32.totalorder %s722_s18, 1  ;;  %p173_p8 = scmp.lt.s32.totalorder %s722_s18, 3 }
   0xc   : > { %p174_p9 = pnand %p500_p7, %p173_p8 }
   0xd   : > { %v211_v0 = vld [vmem:[%s942_s2] sm:$0xff] (!%p174_p9)  ;;  %v212_v1 = vld [vmem:[%s942_s2 + $0x8] sm:$0xff] (!%p174_p9)  ;;  %vm227_vm0 = vcmask (!%p174_p9), 261120   ;;  %v724_v2 = vmov (!%p174_p9), 0.0|0.0   ;;  %p201_p10 = scmp.lt.s32.totalorder (!%p174_p9), %s775_s19, 1  ;;  %vm725_vm2 = vmmov (!%p174_p9), 0   ;;  %v349_v32 = vlaneseq (!%p174_p9) }
   0xe   : > { %177 = sbr.rel (%p174_p9) target bundleno = 669 (0x29d), region = 36  ;;  %578 = vmatprep.subr.bf16.mxu0 (!%p174_p9), %v724_v2  ;;  %v579_v3 = vpack.c.bf16 (!%p174_p9), %v212_v1, %v211_v0  ;;  %vm810_vm1 = vmpackc.low (!%p174_p9), %vm227_vm0, %vm227_vm0  ;;  %v726_v5 = vmov (!%p174_p9), 0.0   ;;  %v727_v6 = vmov (!%p174_p9), 0   ;;  %v213_v7 = vld [vmem:[%s942_s2 + $0x10] sm:$0xff] (!%p174_p9)  ;;  %v214_v8 = vld [vmem:[%s942_s2 + $0x18] sm:$0xff] (!%p174_p9)  ;;  %s521_s9 = sshll.u32 (!%p174_p9), %s775_s19, 3 }
   0xf   : > { %575 = vmatprep.mubr.msk.f32.mxu0 (!%p174_p9), %vm725_vm2, %v726_v5  ;;  %657 = vset.pattern.permute.xlu0 (!%p174_p9), %v727_v6  ;;  %v583_v9 = vpack.c.bf16 (!%p174_p9), %v214_v8, %v213_v7  ;;  %v215_v14 = vld [vmem:[%s942_s2 + $0x20] sm:$0xff] (!%p174_p9)  ;;  %v216_v15 = vld [vmem:[%s942_s2 + $0x28] sm:$0xff] (!%p174_p9)  ;;  %v217_v17 = vld [vmem:[%s942_s2 + $0x30] sm:$0xff] (!%p174_p9)  ;;  %v883_v33 = vand.u32 (!%p174_p9), 127, %v349_v32  ;;  %v381_v45 = vshrl.u32 (!%p174_p9), %v349_v32, 7  ;;  %v382_v46 = vstv (!%p174_p9), %s521_s9  ;;  %s523_s11 = sshll.u32 (!%p174_p9), %s775_s19, 4 }
  0x10   : > { %581 = vmatpush3.bf16.xpose.msk.msra.mxu0 (!%p174_p9), %vm810_vm1, %v579_v3  ;;  %v587_v16 = vpack.c.bf16 (!%p174_p9), %v216_v15, %v215_v14  ;;  %v218_v18 = vld [vmem:[%s942_s2 + $0x38] sm:$0xff] (!%p174_p9)  ;;  %v219_v20 = vld [vmem:[%s942_s2 + $0x40] sm:$0xff] (!%p174_p9)  ;;  %v220_v21 = vld [vmem:[%s942_s2 + $0x48] sm:$0xff] (!%p174_p9)  ;;  %vm386_vm5 = vcmask (!%p174_p9), 7168   ;;  %s898_s27 = scalar_lea.hbm (!%p174_p9), %s944_s4, %s523_s11  ;;  %s728_s29 = smov (!%p174_p9), [#allocation2]  }
  0x11   : > { %582 = vmatprep.subr.bf16.mxu0 (!%p174_p9), %v724_v2  ;;  %v591_v19 = vpack.c.bf16 (!%p174_p9), %v218_v18, %v217_v17  ;;  %v595_v22 = vpack.c.bf16 (!%p174_p9), %v220_v21, %v219_v20  ;;  %v221_v23 = vld [vmem:[%s942_s2 + $0x50] sm:$0xff] (!%p174_p9)  ;;  %v222_v24 = vld [vmem:[%s942_s2 + $0x58] sm:$0xff] (!%p174_p9)  ;;  %v223_v26 = vld [vmem:[%s942_s2 + $0x60] sm:$0xff] (!%p174_p9)  ;;  %v383_v49 = vadd.s32 (!%p174_p9), %v382_v46, %v381_v45  ;;  %vm411_vm7 = vcmp.eq.s32.totalorder (!%p174_p9), %v883_v33, 1  ;;  %s664_s30 = sshll.u32 (!%p174_p9), %s728_s29, 4  ;;  %s665_s30 = int_to_ptr.vmem [resolvable:$false] %s664_s30 }
  0x12   : > { %v599_v25 = vpack.c.bf16 (!%p174_p9), %v222_v24, %v221_v23  ;;  %v224_v27 = vld [vmem:[%s942_s2 + $0x68] sm:$0xff] (!%p174_p9)  ;;  %v225_v29 = vld [vmem:[%s942_s2 + $0x70] sm:$0xff] (!%p174_p9)  ;;  %v226_v30 = vld [vmem:[%s942_s2 + $0x78] sm:$0xff] (!%p174_p9)  ;;  %vm410_vm8 = vcmp.eq.s32.totalorder (!%p174_p9), %v883_v33, 0 }
  0x13   : > { %v603_v28 = vpack.c.bf16 (!%p174_p9), %v224_v27, %v223_v26  ;;  %v607_v31 = vpack.c.bf16 (!%p174_p9), %v226_v30, %v225_v29  ;;  %v520_v34 = vld [vmem:[%s943_s3] ss:$0 sm:$0xff] (!%p174_p9)  ;;  %vm384_vm4 = vcmp.lt.s32.totalorder (!%p174_p9), %v383_v49, 16 }
  0x15   : > { %s202_s5 = scalar_select %p201_p10, %s775_s19, 1 }
  0x17   : > { %s501_s10 = sshll.u32 %s202_s5, 3  ;;  %s666_s5 = scalar_lea.vmem %s665_s30, 32 }
  0x18   : > { %s208_s13 = scalar_lea.vmem %s941_s1, %s501_s10  ;;  %s204_s22 = scalar_lea.vmem %s940_s0, %s501_s10  ;;  %585 = vmatpush3.bf16.xpose.msk.msra.mxu0 %vm810_vm1, %v583_v9 }
  0x19   : > { %v209_v10 = vld [vmem:[%s208_s13] sm:$0xff]  ;;  %586 = vmatprep.subr.bf16.mxu0 %v724_v2  ;;  %s199_s10 = sand.u32 1, %s714_s16  }
  0x1a   : > { %v210_v11 = vld [vmem:[%s204_s22] sm:$0xff]  ;;  %v368_v12 = vmul.f32 %v209_v10, %v209_v10  ;;  %s200_s13 = scalar_lea.vmem [#allocation2], %s199_s10  ;;  %s418_s19 = scalar_lea.sflag [#allocation3], %s199_s10 }
  0x1b   : > { %352 = vperm.xlu0 %657, %v210_v11   ;;  %s430_s14 = sshll.u32 %s200_s13, 4  ;;  %s900_s14 = int_to_ptr.vmem [resolvable:$true] %s430_s14 }
  0x1c   : > { %v369_v13 = vsel %vm227_vm0, %v368_v12, 0.0  ;;  %s660_s28 = scalar_lea.vmem %s900_s14, 16  ;;  %p667_p0 = scmp.lt.s32.totalorder %s900_s14, %s665_s30 }
  0x1d   : > { %370 = vadd.xlane.f32.xlu1 %v369_v13  ;;  %p661_p11 = scmp.ne.s32.totalorder %s900_s14, %s660_s28  ;;  %p668_p1 = scmp.lt.s32.totalorder %s666_s5, %s660_s28 }
  0x1f   : > { %p662_p12 = pnand %p661_p11, %p792_p5  ;;  %p669_p2 = por %p668_p1, %p667_p0 }
  0x20   : > { %589 = vmatpush3.bf16.xpose.msk.msra.mxu0 %vm810_vm1, %v587_v16 }
  0x21   : > { %590 = vmatprep.subr.bf16.mxu0 %v724_v2  ;;  %p663_p13 = pneg %p662_p12 }
  0x23   : > { %p670_p3 = pnand %p669_p2, %p663_p13 }
  0x28   : > { %593 = vmatpush3.bf16.xpose.msk.msra.mxu0 %vm810_vm1, %v591_v19 }
  0x29   : > { %594 = vmatprep.subr.bf16.mxu0 %v724_v2 }
  0x30   : > { %597 = vmatpush3.bf16.xpose.msk.msra.mxu0 %vm810_vm1, %v595_v22 }
  0x31   : > { %598 = vmatprep.subr.bf16.mxu0 %v724_v2 }
  0x38   : > { %601 = vmatpush3.bf16.xpose.msk.msra.mxu0 %vm810_vm1, %v599_v25 }
  0x39   : > { %602 = vmatprep.subr.bf16.mxu0 %v724_v2 }
  0x40   : > { %605 = vmatpush3.bf16.xpose.msk.msra.mxu0 %vm810_vm1, %v603_v28 }
  0x41   : > { %606 = vmatprep.subr.bf16.mxu0 %v724_v2 }
  0x48   : > { %609 = vmatpush3.bf16.xpose.msk.msra.mxu0 %vm810_vm1, %v607_v31 }
  0x4f   : > { %576 = vmatmul.mubr.msk.f32.vlgmr.msra.gmra.mrb[0].mxu0 %vm227_vm0, %v209_v10 }
  0x9a   : > { %v353_v35 = vpop.permute.xlu0 %352 }
  0x9b   : > { %vm354_vm3 = vcmp.eq.s32.totalorder %v883_v33, %v353_v35 }
  0x9c   : > { %v365_v36 = vsel %vm354_vm3, %v520_v34, 0.0 }
  0x9d   : > { %366 = vadd.xlane.f32.xlu0 %v365_v36 }
  0xaa   : > { %v371_v40 = vpop.xlane.xlu1 %370 }
 0x122   : > { %v345_v37 = vpop.f32.mrb[0].mxu0 }
 0x123   : > { %v577_v38 = vpop.f32.mrb[1].mxu0  ;;  %v355_v39 = vsel %vm354_vm3, %v345_v37, 0.0 }
 0x124   : > { %356 = vadd.xlane.f32.xlu1 %v355_v39 }
 0x12a   : > { %v367_v41 = vpop.xlane.xlu0 %366 }
 0x12b   : > { %v372_v42 = vmul.f32 %v371_v40, %v367_v41 }
 0x12d   : > { %v373_v43 = vmax.f32 %v372_v42, 1e-16 }
 0x12f   : > { %658 = vrsqrt.f32 %v373_v43 }
 0x139   : > { %v659_v44 = vpop.eup %658 }
 0x1b1   : > { %v357_v47 = vpop.xlane.xlu1 %356 }
 0x1b2   : > { %v375_v48 = vmul.f32 %v659_v44, %v357_v47 }
 0x1b4   : > { %v376_v50 = vsub.f32 1.0, %v375_v48 }
 0x1b6   : > { %v377_v51 = vadd.f32 0.5, %v376_v50 }
 0x1b8   : > { %v378_v52 = vmax.f32 %v377_v51, 0.0 }
 0x1ba   : > { %v385_v53 = vsel %vm384_vm4, %v378_v52, 0.0 }
 0x1bb   : > { %v387_v54 = vsel %vm386_vm5, %v385_v53, 0.0  ;;  %vm397_vm6 = vcmp.gt.f32.partialorder %v385_v53, 0.0 }
 0x1bc   : > { %388 = vadd.xlane.f32.xlu1 %v387_v54  ;;  %v522_v55 = vsel %vm397_vm6, 1.0, %v726_v5 }
 0x1bd   : > { %v400_v56 = vsel %vm386_vm5, %v522_v55, 0.0 }
 0x1c0   : > { %401 = vadd.xlane.f32.xlu1 %v400_v56 }
 0x249   : > { %v389_v57 = vpop.xlane.xlu1 %388 }
 0x24a   : > { %v390_v58 = vrot.slane %v389_v57, 4 }
 0x24c   : > { %v391_v59 = vadd.f32 %v390_v58, %v389_v57 }
 0x24d   : > { %v402_v60 = vpop.xlane.xlu1 %401 }
 0x24e   : > { %v392_v61 = vrot.slane %v391_v59, 2  ;;  %v403_v62 = vrot.slane %v402_v60, 4 }
 0x250   : > { %v404_v63 = vadd.f32 %v403_v62, %v402_v60  ;;  %v393_v0 = vadd.f32 %v392_v61, %v391_v59 }
 0x252   : > { %v405_v1 = vrot.slane %v404_v63, 2  ;;  %v394_v2 = vrot.slane %v393_v0, 1 }
 0x254   : > { %v406_v3 = vadd.f32 %v405_v1, %v404_v63  ;;  %v395_v4 = vadd.f32 %v394_v2, %v393_v0 }
 0x256   : > { %610 = vpush %v395_v4  ;;  %v407_v6 = vrot.slane %v406_v3, 1 }
 0x258   : > { %v408_v7 = vadd.f32 %v407_v6, %v406_v3 }
 0x25a   : > { %612 = vpush %v408_v7 }
 0x287   : > { %s611_s12 = spop %610 }
 0x288   : > { %v414_v8 = vstv %s611_s12 }
 0x28b   : > { %s613_s20 = spop %612 }
 0x28c   : > { %v412_v5 = vstv %s613_s20 }
 0x28d   : > { %v413_v9 = vsel %vm411_vm7, %v412_v5, 0.0 }
 0x28e   : > { %v415_v10 = vsel %vm410_vm8, %v414_v8, %v413_v9 }
 0x28f   : > { %416 = vst [vmem:[%s200_s13] sm:$0x1] %v415_v10 }
 0x290   : > { %673 = shalt.err (!%p670_p3)
}
 0x291   : > { %s674_s6 = scalar_lea.hbm %s898_s27, 16  ;;  %s678_s9 = scalar_lea.hbm %s944_s4, 32 }
 0x292   : > { %p675_p4 = scmp.ne.s32.totalorder %s898_s27, %s674_s6  ;;  %p679_p9 = scmp.lt.u32.totalorder %s898_s27, %s944_s4 }
 0x293   : > { %p680_p10 = scmp.lt.u32.totalorder %s678_s9, %s674_s6  ;;  %p682_p12 = scmp.lt.u32.totalorder %s674_s6, %s898_s27 }
 0x294   : > { %p676_p7 = pnand %p675_p4, %p792_p5 }
 0x295   : > { %p681_p11 = por %p680_p10, %p679_p9 }
 0x296   : > { %p677_p8 = pneg %p676_p7 }
 0x297   : > { %p683_p13 = por %p682_p12, %p681_p11 }
 0x299   : > { %p684_p0 = pnand %p683_p13, %p677_p8 }
 0x29b   : > { %687 = shalt.err (!%p684_p0)
}
 0x29c   : > { %614 = dma.vmem_to_hbm [thread:$0]  (%p792_p5), %s900_s14, 16, %s898_s27, %s418_s19  }
 0x29d PF: > { %p620_p1 = scmp.ge.s32.totalorder %s722_s18, 2  ;;  %s442_s12 = sand.u32 1, %s710_s15  }
 0x29e   : > { %s443_s13 = scalar_lea.sflag [#allocation3], %s442_s12 }
 0x29f   : > { %p617_p2 = pnand %p620_p1, %p796_p6 }
 0x2a1   : > { %705 = dma.done.wait (!%p617_p2), %s443_s13, 16  }
 0x2a2   : > { %707 = vsyncadd (!%p617_p2), %s443_s13, 4294967280  ;;  %p14_p3 = scmp.ge.s32.totalorder %s779_s21, 4   ;;  %s949_s15 = smov %s714_s16 }
 0x2a3   : > { %s950_s16 = smov %s718_s17  ;;  %s951_s17 = smov %s790_s24 }
 0x2a4   : > { %s952_s18 = smov %s779_s21  ;;  %16 = sbr.rel (!%p14_p3) target bundleno = 3 (0x3), region = 74 }
 0x2ab   :  { %447 = vsyncpa [#allocation3], 1 }
 0x2ac   :  { %449 = vsyncpa [#allocation3 + $0x1], 1 }

</bundles_post_ra>
